<compile_context>
chip_gen: v5e
topology: v5e:2x2
jax: 0.10.0
libtpu: 0.0.40
codegen_flags: <defaults>
</compile_context>

<pallas_src>
import functools

import jax
import jax.numpy as jnp
from jax.experimental import pallas as pl
from jax.experimental.pallas import tpu as pltpu

_LANES = 128
_VMEM_LIMIT_BYTES = 32 * 1024 * 1024  # fits v5e/v6e (128 MiB) and v7x (64 MiB)


def _round_up(a: int, b: int) -> int:
    return ((a + b - 1) // b) * b


# ----------------------------------------------------------------------------
# Kernels
# ----------------------------------------------------------------------------
def _packed_kernel(x_ref, wtb_ref, ones_ref, b_ref, o_ref, *, feat):
    """Lane-dense path: PACK = 128 // feat original rows per 128-lane row.

    x_ref   : (bp, 128)   packed input rows (native dtype)
    wtb_ref : (128, 128)  kron(I_PACK, W.T), resident, native dtype
    ones_ref: (128, 128)  kron(I_PACK, ones(feat, feat)), f32, resident
    b_ref   : (1, 128)    bias tiled PACK times, f32, resident
    o_ref   : (bp, 128)   packed output rows
    """
    xp = x_ref[...]
    pack = xp.shape[-1] // feat

    # Linear: block-diagonal matmul == per-original-row x @ W.T (MXU, native
    # dtype operands, f32 accumulation).
    logits = jnp.dot(xp, wtb_ref[...],
                     preferred_element_type=jnp.float32) + b_ref[...]

    # Exact per-original-row max: reduce each aligned `feat`-lane segment and
    # broadcast it back over that segment (static lane slices + concat).
    rows = logits.shape[0]
    seg_max = [
        jnp.broadcast_to(
            jnp.max(logits[:, g * feat:(g + 1) * feat], axis=-1, keepdims=True),
            (rows, feat))
        for g in range(pack)
    ]
    m = jnp.concatenate(seg_max, axis=-1) if pack > 1 else seg_max[0]

    e = jnp.exp(logits - m)                       # f32, EUP
    # Per-original-row sum, broadcast back to every lane of its segment, done
    # on the (otherwise idle) MXU via the block-diagonal ones matrix.
    denom = jnp.dot(e, ones_ref[...], preferred_element_type=jnp.float32)
    attn = e * pl.reciprocal(denom, approx=True)  # EUP vrcp
    o_ref[...] = (attn * xp).astype(o_ref.dtype)


def _rowwise_kernel(x_ref, wt_ref, b_ref, o_ref):
    """General fallback (any in_dim): one original row per vector row."""
    x = x_ref[...]
    logits = jnp.dot(x, wt_ref[...],
                     preferred_element_type=jnp.float32) + b_ref[...]
    m = jnp.max(logits, axis=-1, keepdims=True)
    e = jnp.exp(logits - m)
    denom = jnp.sum(e, axis=-1, keepdims=True)
    attn = e * pl.reciprocal(denom, approx=True)
    o_ref[...] = (attn * x).astype(o_ref.dtype)


# ----------------------------------------------------------------------------
# Wrappers
# ----------------------------------------------------------------------------
def _cost_estimate(n, f, itemsize):
    return pl.CostEstimate(
        flops=int(2 * n * f * f),
        transcendentals=int(n * f),
        bytes_accessed=int((2 * n * f + f * f + f) * itemsize),
    )


def _feature_attention_packed(x, weight, bias, block_rows):
    n, f = x.shape
    pack = _LANES // f
    itemsize = jnp.dtype(x.dtype).itemsize

    np_raw = pl.cdiv(n, pack)                     # packed rows needed
    if block_rows is None:
        block_rows = 4096                         # 128-lane rows -> 2 MiB/buffer (f32)
    # Cap the tile at half the (rounded) work so the grid has >= 2 steps when
    # there is enough data (keeps both v7x TensorCores busy); never below 8
    # rows (sublane granularity).
    bp = min(block_rows, max(8, _round_up(pl.cdiv(np_raw, 2), 8)))
    np_pad = _round_up(np_raw, bp)
    n_pad = np_pad * pack

    x_pad = jnp.pad(x, ((0, n_pad - n), (0, 0))) if n_pad != n else x
    xp = x_pad.reshape(np_pad, _LANES)            # free row-major reshape

    # Block-diagonal operands so the packed matmul equals per-row x @ W.T.
    wtb = jnp.kron(jnp.eye(pack, dtype=weight.dtype), weight.T).astype(x.dtype)
    ones_blk = jnp.kron(jnp.eye(pack, dtype=jnp.float32),
                        jnp.ones((f, f), dtype=jnp.float32))
    b_pk = jnp.tile(bias.astype(jnp.float32), pack).reshape(1, _LANES)

    # NOTE: the resident (128,128) operands are only 64 KiB each here, so the
    # default double-buffering is negligible.  For very large feature dims the
    # rowwise path's resident weight should be single-buffered
    # (pipeline_mode=pl.Buffered(1)) or K-tiled -- see TODO below.
    out_packed = pl.pallas_call(
        functools.partial(_packed_kernel, feat=f),
        out_shape=jax.ShapeDtypeStruct((np_pad, _LANES), x.dtype),
        grid_spec=pltpu.PrefetchScalarGridSpec(
            num_scalar_prefetch=0,
            grid=(np_pad // bp,),
            in_specs=[
                pl.BlockSpec((bp, _LANES), lambda i: (i, 0)),       # x (pipelined)
                pl.BlockSpec((_LANES, _LANES), lambda i: (0, 0)),   # kron(I, W.T)
                pl.BlockSpec((_LANES, _LANES), lambda i: (0, 0)),   # kron(I, ones)
                pl.BlockSpec((1, _LANES), lambda i: (0, 0)),        # bias
            ],
            out_specs=pl.BlockSpec((bp, _LANES), lambda i: (i, 0)),
        ),
        compiler_params=pltpu.CompilerParams(
            dimension_semantics=("parallel",),
            vmem_limit_bytes=_VMEM_LIMIT_BYTES,
        ),
        cost_estimate=_cost_estimate(n, f, itemsize),
    )(xp, wtb, ones_blk, b_pk)

    out = out_packed.reshape(n_pad, f)
    return out[:n] if n_pad != n else out


def _feature_attention_rowwise(x, weight, bias, block_rows):
    n, f = x.shape
    itemsize = jnp.dtype(x.dtype).itemsize
    if block_rows is None:
        # Target ~2 MiB per input buffer, capped, at least 8 rows.
        block_rows = max(8, min(4096, _round_up((2 << 20) // max(f * itemsize, 1), 8)))
    bm = min(block_rows, max(8, _round_up(pl.cdiv(n, 2), 8)))
    n_pad = _round_up(n, bm)
    x_pad = jnp.pad(x, ((0, n_pad - n), (0, 0))) if n_pad != n else x

    wt = weight.T.astype(x.dtype)                 # native dtype straight to the MXU
    b = bias.astype(jnp.float32).reshape(1, f)

    # TODO(synk): for very large in_dim (>~1.5k f32 on v7x) the resident (F,F)
    # weight should be single-buffered / K-tiled with an f32 accumulator.
    out = pl.pallas_call(
        _rowwise_kernel,
        out_shape=jax.ShapeDtypeStruct((n_pad, f), x.dtype),
        grid_spec=pltpu.PrefetchScalarGridSpec(
            num_scalar_prefetch=0,
            grid=(n_pad // bm,),
            in_specs=[
                pl.BlockSpec((bm, f), lambda i: (i, 0)),
                pl.BlockSpec((f, f), lambda i: (0, 0)),
                pl.BlockSpec((1, f), lambda i: (0, 0)),
            ],
            out_specs=pl.BlockSpec((bm, f), lambda i: (i, 0)),
        ),
        compiler_params=pltpu.CompilerParams(
            dimension_semantics=("parallel",),
            vmem_limit_bytes=_VMEM_LIMIT_BYTES,
        ),
        cost_estimate=_cost_estimate(n, f, itemsize),
    )(x_pad, wt, b)
    return out[:n] if n_pad != n else out


def feature_attention(x, weight, bias, *, block_rows=None):
    """FeatureAttention forward.

    x: (N, F) with N = batch*seq_len; weight: (F, F) PyTorch layout (out, in);
    bias: (F,).  Returns softmax(x @ W.T + b, axis=1) * x.
    """
    _, f = x.shape
    can_pack = (8 <= f <= _LANES) and (_LANES % f == 0) and (f & (f - 1) == 0)
    if can_pack:
        return _feature_attention_packed(x, weight, bias, block_rows)
    return _feature_attention_rowwise(x, weight, bias, block_rows)


def feature_attention_ref(x, weight, bias):
    """Pure-JAX reference mirroring the PyTorch forward."""
    logits = x @ weight.T + bias
    attn = jax.nn.softmax(logits, axis=1)
    return attn * x


# ----------------------------------------------------------------------------
# Self-test
# ----------------------------------------------------------------------------
if __name__ == "__main__":
    key = jax.random.PRNGKey(0)
    k_x, k_w, k_b, k_x2, k_w2, k_b2 = jax.random.split(key, 6)

    # Shapes consistent with the module: rows = batch*seq_len, features = in_dim.
    batch, seq_len, in_dim = 2, 8, 32
    N = batch * seq_len

    x = jax.random.normal(k_x, (N, in_dim), dtype=jnp.float32)
    bound = 1.0 / jnp.sqrt(in_dim)
    weight = jax.random.uniform(k_w, (in_dim, in_dim),
                                minval=-bound, maxval=bound, dtype=jnp.float32)
    bias = jax.random.uniform(k_b, (in_dim,),
                              minval=-bound, maxval=bound, dtype=jnp.float32)

    out = jax.block_until_ready(feature_attention(x, weight, bias))
    ref = feature_attention_ref(x, weight, bias)
    assert out.shape == (N, in_dim)
    # approx reciprocal -> slightly looser tolerance than the exact-recip version.
    assert jnp.allclose(out, ref, atol=2e-3, rtol=2e-3), "packed path mismatch"

    # Exercise the general fallback path (non-power-of-two feature dim, ragged N).
    N2, F2 = 10, 48
    x2 = jax.random.normal(k_x2, (N2, F2), dtype=jnp.float32)
    bound2 = 1.0 / jnp.sqrt(F2)
    w2 = jax.random.uniform(k_w2, (F2, F2), minval=-bound2, maxval=bound2,
                            dtype=jnp.float32)
    b2 = jax.random.uniform(k_b2, (F2,), minval=-bound2, maxval=bound2,
                            dtype=jnp.float32)
    out2 = jax.block_until_ready(feature_attention(x2, w2, b2))
    ref2 = feature_attention_ref(x2, w2, b2)
    assert out2.shape == (N2, F2)
    assert jnp.allclose(out2, ref2, atol=2e-3, rtol=2e-3), "rowwise path mismatch"

    print("KERNEL_OK")
</pallas_src>

<mosaic_0001>
module attributes {stable_mosaic.version = 11 : i64} {
  func.func @_packed_kernel(%arg0: i32, %arg1: memref<8x128xf32, #tpu.memory_space<vmem>>, %arg2: memref<128x128xf32, #tpu.memory_space<vmem>>, %arg3: memref<128x128xf32, #tpu.memory_space<vmem>>, %arg4: memref<1x128xf32, #tpu.memory_space<vmem>>, %arg5: memref<8x128xf32, #tpu.memory_space<vmem>>) attributes {dimension_semantics = [#tpu.dimension_semantics<parallel>], iteration_bounds = array<i64: 1>, scalar_prefetch = 0 : i64, scratch_operands = 0 : i64, tpu.core_type = #tpu.core_type<tc>, window_params = [{transform_indices = @transform_0, window_bounds = array<i64: 8, 128>}, {pipeline_mode = #tpu.pipeline_mode<synchronous>, transform_indices = @transform_1, window_bounds = array<i64: 128, 128>}, {pipeline_mode = #tpu.pipeline_mode<synchronous>, transform_indices = @transform_2, window_bounds = array<i64: 128, 128>}, {pipeline_mode = #tpu.pipeline_mode<synchronous>, transform_indices = @transform_3, window_bounds = array<i64: 1, 128>}, {transform_indices = @transform_4, window_bounds = array<i64: 8, 128>}]} {
    %c0 = arith.constant 0 : index
    %c0_0 = arith.constant 0 : index
    %0 = vector.load %arg1[%c0, %c0_0] : memref<8x128xf32, #tpu.memory_space<vmem>>, vector<8x128xf32>
    %c0_1 = arith.constant 0 : index
    %c0_2 = arith.constant 0 : index
    %1 = vector.load %arg2[%c0_1, %c0_2] : memref<128x128xf32, #tpu.memory_space<vmem>>, vector<128x128xf32>
    %cst = arith.constant dense<0.000000e+00> : vector<8x128xf32>
    %2 = tpu.matmul %0, %1, %cst {dimension_numbers = #tpu.dot_dimension_numbers<[1], [0], [0], [1], [0, 0, 1, 1], [], []>} : vector<8x128xf32>, vector<128x128xf32>, vector<8x128xf32> -> vector<8x128xf32>
    %c0_3 = arith.constant 0 : index
    %c0_4 = arith.constant 0 : index
    %3 = vector.load %arg4[%c0_3, %c0_4] : memref<1x128xf32, #tpu.memory_space<vmem>>, vector<1x128xf32>
    %4 = vector.broadcast %3 : vector<1x128xf32> to vector<8x128xf32>
    %5 = arith.addf %2, %4 : vector<8x128xf32>
    %6 = vector.extract_strided_slice %5 {offsets = [0, 0], sizes = [8, 32], strides = [1, 1]} : vector<8x128xf32> to vector<8x32xf32>
    %cst_5 = arith.constant dense<0xFF800000> : vector<8xf32>
    %7 = vector.multi_reduction <maximumf>, %6, %cst_5 [1] : vector<8x32xf32> to vector<8xf32>
    %8 = vector.shape_cast %7 : vector<8xf32> to vector<8x1xf32>
    %9 = vector.shape_cast %8 : vector<8x1xf32> to vector<8x1xf32>
    %10 = vector.broadcast %9 : vector<8x1xf32> to vector<8x32xf32>
    %11 = vector.extract_strided_slice %5 {offsets = [0, 32], sizes = [8, 32], strides = [1, 1]} : vector<8x128xf32> to vector<8x32xf32>
    %cst_6 = arith.constant dense<0xFF800000> : vector<8xf32>
    %12 = vector.multi_reduction <maximumf>, %11, %cst_6 [1] : vector<8x32xf32> to vector<8xf32>
    %13 = vector.shape_cast %12 : vector<8xf32> to vector<8x1xf32>
    %14 = vector.shape_cast %13 : vector<8x1xf32> to vector<8x1xf32>
    %15 = vector.broadcast %14 : vector<8x1xf32> to vector<8x32xf32>
    %16 = vector.extract_strided_slice %5 {offsets = [0, 64], sizes = [8, 32], strides = [1, 1]} : vector<8x128xf32> to vector<8x32xf32>
    %cst_7 = arith.constant dense<0xFF800000> : vector<8xf32>
    %17 = vector.multi_reduction <maximumf>, %16, %cst_7 [1] : vector<8x32xf32> to vector<8xf32>
    %18 = vector.shape_cast %17 : vector<8xf32> to vector<8x1xf32>
    %19 = vector.shape_cast %18 : vector<8x1xf32> to vector<8x1xf32>
    %20 = vector.broadcast %19 : vector<8x1xf32> to vector<8x32xf32>
    %21 = vector.extract_strided_slice %5 {offsets = [0, 96], sizes = [8, 32], strides = [1, 1]} : vector<8x128xf32> to vector<8x32xf32>
    %cst_8 = arith.constant dense<0xFF800000> : vector<8xf32>
    %22 = vector.multi_reduction <maximumf>, %21, %cst_8 [1] : vector<8x32xf32> to vector<8xf32>
    %23 = vector.shape_cast %22 : vector<8xf32> to vector<8x1xf32>
    %24 = vector.shape_cast %23 : vector<8x1xf32> to vector<8x1xf32>
    %25 = vector.broadcast %24 : vector<8x1xf32> to vector<8x32xf32>
    %26 = tpu.concatenate %10, %15, %20, %25 in 1 : vector<8x32xf32>, vector<8x32xf32>, vector<8x32xf32>, vector<8x32xf32> -> vector<8x128xf32>
    %27 = arith.subf %5, %26 : vector<8x128xf32>
    %28 = math.exp %27 : vector<8x128xf32>
    %c0_9 = arith.constant 0 : index
    %c0_10 = arith.constant 0 : index
    %29 = vector.load %arg3[%c0_9, %c0_10] : memref<128x128xf32, #tpu.memory_space<vmem>>, vector<128x128xf32>
    %cst_11 = arith.constant dense<0.000000e+00> : vector<8x128xf32>
    %30 = tpu.matmul %28, %29, %cst_11 {dimension_numbers = #tpu.dot_dimension_numbers<[1], [0], [0], [1], [0, 0, 1, 1], [], []>} : vector<8x128xf32>, vector<128x128xf32>, vector<8x128xf32> -> vector<8x128xf32>
    %31 = tpu.reciprocal %30 {approx = true} : vector<8x128xf32> -> vector<8x128xf32>
    %32 = arith.mulf %28, %31 : vector<8x128xf32>
    %33 = arith.mulf %32, %0 : vector<8x128xf32>
    %c0_12 = arith.constant 0 : index
    %c0_13 = arith.constant 0 : index
    %34 = vector.load %arg5[%c0_12, %c0_13] : memref<8x128xf32, #tpu.memory_space<vmem>>, vector<8x128xf32>
    tpu.vector_store %arg5[%c0_12, %c0_13], %33 {strides = array<i32>} : memref<8x128xf32, #tpu.memory_space<vmem>>, vector<8x128xf32>,
    return
  }
  func.func @transform_0(%arg0: i32) -> (i32, i32) {
    %c0_i32 = arith.constant 0 : i32
    %c0_i32_0 = arith.constant 0 : i32
    return %arg0, %c0_i32 : i32, i32
  }
  func.func @transform_1(%arg0: i32) -> (i32, i32) {
    %c0_i32 = arith.constant 0 : i32
    %c0_i32_0 = arith.constant 0 : i32
    %c0_i32_1 = arith.constant 0 : i32
    return %c0_i32, %c0_i32_0 : i32, i32
  }
  func.func @transform_2(%arg0: i32) -> (i32, i32) {
    %c0_i32 = arith.constant 0 : i32
    %c0_i32_0 = arith.constant 0 : i32
    %c0_i32_1 = arith.constant 0 : i32
    return %c0_i32, %c0_i32_0 : i32, i32
  }
  func.func @transform_3(%arg0: i32) -> (i32, i32) {
    %c0_i32 = arith.constant 0 : i32
    %c0_i32_0 = arith.constant 0 : i32
    %c0_i32_1 = arith.constant 0 : i32
    return %c0_i32, %c0_i32_0 : i32, i32
  }
  func.func @transform_4(%arg0: i32) -> (i32, i32) {
    %c0_i32 = arith.constant 0 : i32
    %c0_i32_0 = arith.constant 0 : i32
    return %arg0, %c0_i32 : i32, i32
  }
}

</mosaic_0001>

<bundles_post_ra>
// kernel: tpu_custom_call.1
= control target key start
LH: loop header
LB: loop body
LE: loop exit
PB: predicated region body
PF: predicated region fallthrough
CT: control target
= control target key end

     0   :  { %9 = vsyncpa [#allocation3], 0  ;;  %s351_s0 = inlined_call_operand.hbm [shape: f32[8,128], index: 0, kind: input, shape index: {}]   ;;  %s352_s1 = inlined_call_operand.hbm [shape: f32[128,128], index: 1, kind: input, shape index: {}]   ;;  %s353_s2 = inlined_call_operand.hbm [shape: f32[128,128], index: 2, kind: input, shape index: {}]   ;;  %s354_s3 = inlined_call_operand.vmem [shape: f32[1,128], index: 3, kind: input, shape index: {}]   ;;  %s355_s4 = inlined_call_operand.hbm [shape: f32[8,128], index: 4, kind: output, shape index: {}]  }
   0x1   :  { %10 = vsyncpa [#allocation6], 0  ;;  %s27_s17 = sshll.u32 %s352_s1, 4  ;;  %s28_s17 = int_to_ptr.hbm [resolvable:$true] %s27_s17 }
   0x2   :  { %11 = vsyncpa [#allocation4], 0  ;;  %s299_s18 = smov [#allocation5]   ;;  %s17_s22 = sshll.u32 %s351_s0, 4  ;;  %s18_s22 = int_to_ptr.hbm [resolvable:$true] %s17_s22 }
   0x3   :  { %s29_s19 = sshll.u32 %s299_s18, 4  ;;  %s300_s23 = smov 128   ;;  %s30_s19 = int_to_ptr.vmem [resolvable:$true] %s29_s19 }
   0x4   :  { %s301_s24 = smov 8   ;;  %s302_s25 = smov [#allocation2]  }
   0x5   :  { %35 = dma.hbm_to_vmem [thread:$0]  %s28_s17, 2048, %s30_s19, [#allocation6], %s300_s23, %s300_s23, %s301_s24  }
   0x6   :  { %s19_s26 = sshll.u32 %s302_s25, 4  ;;  %s40_s29 = sshll.u32 %s353_s2, 4  ;;  %s20_s26 = int_to_ptr.vmem [resolvable:$true] %s19_s26  ;;  %s41_s29 = int_to_ptr.hbm [resolvable:$true] %s40_s29 }
   0x7   :  { %22 = dma.hbm_to_vmem [thread:$0]  %s18_s22, 128, %s20_s26, [#allocation3]  }
   0x8   :  { %s303_s1 = smov [#allocation7]  }
   0x9   :  { %s42_s30 = sshll.u32 %s303_s1, 4  ;;  %s43_s30 = int_to_ptr.vmem [resolvable:$true] %s42_s30 }
   0xa   :  { %48 = dma.hbm_to_vmem [thread:$0]  %s41_s29, 2048, %s43_s30, [#allocation6], %s300_s23, %s300_s23, %s301_s24  }
   0xb   :  { %293 = dma.done.wait [#allocation3], 128  }
   0xc   :  { %294 = vsyncadd [#allocation3], 4294967168 }
   0xd   :  { %295 = dma.done.wait [#allocation6], 4096  }
   0xe   :  { %296 = vsyncadd [#allocation6], 4294963200  ;;  %v79_v0 = vld [vmem:[#allocation5 + $0x78] sm:$0xff]  ;;  %v78_v1 = vld [vmem:[#allocation5 + $0x70] sm:$0xff]  ;;  %vm112_vm0 = vcmask 785920   ;;  %vm104_vm1 = vcmask 261120  }
   0xf   :  { %84 = vmatpush.msra.mxu0 %v79_v0  ;;  %v77_v2 = vld [vmem:[#allocation5 + $0x68] sm:$0xff]  ;;  %v76_v3 = vld [vmem:[#allocation5 + $0x60] sm:$0xff]  ;;  %v75_v4 = vld [vmem:[#allocation5 + $0x58] sm:$0xff]  ;;  %vm116_vm2 = vcmask 1048320   ;;  %vm108_vm3 = vcmask 523520   ;;  %vm121_vm4 = vcmask 523264  }
  0x10   :  { %v74_v5 = vld [vmem:[#allocation5 + $0x50] sm:$0xff]  ;;  %v73_v6 = vld [vmem:[#allocation5 + $0x48] sm:$0xff]  ;;  %v72_v7 = vld [vmem:[#allocation5 + $0x40] sm:$0xff]  ;;  %vm123_vm5 = vcmask 785408   ;;  %s175_s8 = sshll.u32 %s355_s4, 4  ;;  %s176_s8 = int_to_ptr.hbm [resolvable:$true] %s175_s8 }
  0x11   :  { %85 = vmatpush.msra.mxu0 %v78_v1  ;;  %v71_v8 = vld [vmem:[#allocation5 + $0x38] sm:$0xff]  ;;  %v70_v9 = vld [vmem:[#allocation5 + $0x30] sm:$0xff]  ;;  %v69_v10 = vld [vmem:[#allocation5 + $0x28] sm:$0xff] }
  0x12   :  { %v68_v11 = vld [vmem:[#allocation5 + $0x20] sm:$0xff]  ;;  %v67_v12 = vld [vmem:[#allocation5 + $0x18] sm:$0xff]  ;;  %v66_v13 = vld [vmem:[#allocation5 + $0x10] sm:$0xff] }
  0x13   :  { %86 = vmatpush.msra.mxu0 %v77_v2  ;;  %v65_v14 = vld [vmem:[#allocation5 + $0x8] sm:$0xff]  ;;  %v64_v15 = vld [vmem:[#allocation5] sm:$0xff]  ;;  %v339_v16 = vld [vmem:[#allocation2] sm:$0xff] }
  0x14   :  { %v143_v17 = vld [vmem:[#allocation7 + $0x78] sm:$0xff]  ;;  %v142_v18 = vld [vmem:[#allocation7 + $0x70] sm:$0xff]  ;;  %v141_v19 = vld [vmem:[#allocation7 + $0x68] sm:$0xff] }
  0x15   :  { %87 = vmatpush.msra.mxu0 %v76_v3  ;;  %144 = vmatpush.msra.mxu1 %v143_v17  ;;  %v140_v20 = vld [vmem:[#allocation7 + $0x60] sm:$0xff]  ;;  %v139_v21 = vld [vmem:[#allocation7 + $0x58] sm:$0xff]  ;;  %v138_v29 = vld [vmem:[#allocation7 + $0x50] sm:$0xff] }
  0x16   :  { %v192_v22 = vld [vmem:[%s354_s3] ss:$0 sm:$0xff]  ;;  %v137_v30 = vld [vmem:[#allocation7 + $0x48] sm:$0xff]  ;;  %v136_v31 = vld [vmem:[#allocation7 + $0x40] sm:$0xff]  ;;  %s304_s3 = smov [#allocation8]  }
  0x17   :  { %88 = vmatpush.msra.mxu0 %v75_v4  ;;  %145 = vmatpush.msra.mxu1 %v142_v18  ;;  %v135_v32 = vld [vmem:[#allocation7 + $0x38] sm:$0xff]  ;;  %v134_v33 = vld [vmem:[#allocation7 + $0x30] sm:$0xff]  ;;  %v133_v34 = vld [vmem:[#allocation7 + $0x28] sm:$0xff]  ;;  %s173_s5 = sshll.u32 %s304_s3, 4  ;;  %s174_s5 = int_to_ptr.vmem [resolvable:$true] %s173_s5 }
  0x18   :  { %v132_v35 = vld [vmem:[#allocation7 + $0x20] sm:$0xff]  ;;  %v131_v36 = vld [vmem:[#allocation7 + $0x18] sm:$0xff]  ;;  %v130_v37 = vld [vmem:[#allocation7 + $0x10] sm:$0xff] }
  0x19   :  { %89 = vmatpush.msra.mxu0 %v74_v5  ;;  %146 = vmatpush.msra.mxu1 %v141_v19  ;;  %v129_v38 = vld [vmem:[#allocation7 + $0x8] sm:$0xff]  ;;  %v128_v39 = vld [vmem:[#allocation7] sm:$0xff] }
  0x1b   :  { %90 = vmatpush.msra.mxu0 %v73_v6  ;;  %147 = vmatpush.msra.mxu1 %v140_v20 }
  0x1d   :  { %91 = vmatpush.msra.mxu0 %v72_v7  ;;  %148 = vmatpush.msra.mxu1 %v139_v21 }
  0x1f   :  { %92 = vmatpush.msra.mxu0 %v71_v8  ;;  %149 = vmatpush.msra.mxu1 %v138_v29 }
  0x21   :  { %93 = vmatpush.msra.mxu0 %v70_v9  ;;  %150 = vmatpush.msra.mxu1 %v137_v30 }
  0x23   :  { %94 = vmatpush.msra.mxu0 %v69_v10  ;;  %151 = vmatpush.msra.mxu1 %v136_v31 }
  0x25   :  { %95 = vmatpush.msra.mxu0 %v68_v11  ;;  %152 = vmatpush.msra.mxu1 %v135_v32 }
  0x27   :  { %96 = vmatpush.msra.mxu0 %v67_v12  ;;  %153 = vmatpush.msra.mxu1 %v134_v33 }
  0x29   :  { %97 = vmatpush.msra.mxu0 %v66_v13  ;;  %154 = vmatpush.msra.mxu1 %v133_v34 }
  0x2b   :  { %98 = vmatpush.msra.mxu0 %v65_v14  ;;  %155 = vmatpush.msra.mxu1 %v132_v35 }
  0x2d   :  { %99 = vmatpush.msra.mxu0 %v64_v15  ;;  %156 = vmatpush.msra.mxu1 %v131_v36 }
  0x2e   :  { %100 = vmatmul.f32.vlgmr.msra.gmra.mxu0 %v339_v16 }
  0x2f   :  { %157 = vmatpush.msra.mxu1 %v130_v37 }
  0x31   :  { %158 = vmatpush.msra.mxu1 %v129_v38 }
  0x33   :  { %159 = vmatpush.msra.mxu1 %v128_v39 }
  0xab   :  { %v101_v23 = vpop.f32.mrf.mxu0 }
  0xac   :  { %v102_v24 = vadd.f32 %v192_v22, %v101_v23 }
  0xae   :  { %v113_v25 = vsel %vm112_vm0, %v102_v24, -inf  ;;  %v105_v26 = vsel %vm104_vm1, %v102_v24, -inf  ;;  %v117_v27 = vsel %vm116_vm2, %v102_v24, -inf  ;;  %v109_v28 = vsel %vm108_vm3, %v102_v24, -inf }
  0xaf   :  { %114 = vmax.xlane.f32.xlu1 %v113_v25  ;;  %106 = vmax.xlane.f32.xlu0 %v105_v26 }
  0xb7   :  { %118 = vmax.xlane.f32.xlu1 %v117_v27  ;;  %110 = vmax.xlane.f32.xlu0 %v109_v28 }
 0x122   :  { %v115_v40 = vpop.xlane.xlu1 %114  ;;  %v107_v41 = vpop.xlane.xlu0 %106 }
 0x12a   :  { %v111_v42 = vpop.xlane.xlu0 %110  ;;  %v119_v44 = vpop.xlane.xlu1 %118 }
 0x12b   :  { %v120_v43 = vsel %vm104_vm1, %v107_v41, %v111_v42 }
 0x12c   :  { %v122_v45 = vsel %vm121_vm4, %v120_v43, %v115_v40 }
 0x12d   :  { %v124_v46 = vsel %vm123_vm5, %v122_v45, %v119_v44 }
 0x12e   :  { %v125_v47 = vsub.f32 %v102_v24, %v124_v46 }
 0x130   :  { %v126_v48 = vmul.f32 1.442695, %v125_v47 }
 0x132   :  { %193 = vpow2.f32 %v126_v48 }
 0x138   :  { %v194_v49 = vpop.eup %193 }
 0x139   :  { %160 = vmatmul.f32.vlgmr.msra.gmra.mxu1 %v194_v49 }
 0x1b6   :  { %v161_v50 = vpop.f32.mrf.mxu1 }
 0x1b7   :  { %195 = vrcp.f32 %v161_v50 }
 0x1bd   :  { %v196_v51 = vpop.eup %195 }
 0x1be   :  { %v165_v52 = vmul.f32 %v196_v51, %v194_v49 }
 0x1c0   :  { %v166_v53 = vmul.f32 %v165_v52, %v339_v16 }
 0x1c2   :  { %167 = vst [vmem:[#allocation8] sm:$0xff] %v166_v53 }
 0x1c3   :  { %178 = dma.vmem_to_hbm [thread:$0]  %s174_s5, 128, %s176_s8, [#allocation4]  }
 0x1c4   :  { %297 = dma.done.wait [#allocation4], 128  }
 0x1c5   :  { %298 = vsyncadd [#allocation4], 4294967168 }
 0x1c6   :  { %183 = vsyncpa [#allocation3], 1 }
 0x1c7   :  { %184 = vsyncpa [#allocation6], 1 }
 0x1c8   :  { %185 = vsyncpa [#allocation4], 1 }

</bundles_post_ra>
